<compile_context>
chip_gen: v5e
topology: v5e:2x2
jax: 0.10.0
libtpu: 0.0.40
codegen_flags: <defaults>
</compile_context>

<pallas_src>
import jax
import jax.numpy as jnp
from jax.experimental import pallas as pl
from jax.experimental.pallas import tpu as pltpu


def ca_block_kernel(x_ref, pool_ref, w1_ref, bias_ref, whw_ref, eh_ref, ew_ref, out_ref):
    # x_ref / out_ref : (nb*C, HW)   lane-dense flattened spatial axis
    # pool_ref        : (HW, K)      K = H+W; column k<H averages over W, k>=H over H
    # w1_ref          : (mid, C)     shared 1x1 conv, eval-mode BN scale folded in (f32)
    # bias_ref        : (mid, K)     folded BN bias, pre-broadcast along K (f32)
    # whw_ref         : (2C, mid)    [F_h ; F_w] stacked (f32)
    # eh_ref / ew_ref : (K, HW)      0/1 expansion back to the flat spatial axis
    C = w1_ref.shape[1]
    mid = w1_ref.shape[0]
    nbc, hw = x_ref.shape
    nb = nbc // C
    k = pool_ref.shape[1]

    xb = x_ref[...]                                   # native dtype (f32 or bf16)

    # (1) Both pooling means as ONE lane-dense MXU matmul, M = nb*C.
    pooled = jnp.dot(xb, pool_ref[...],
                     preferred_element_type=jnp.float32)          # (nb*C, K) f32
    pooled3 = pooled.reshape(nb, C, k)                # cheap relayout: C % 8 == 0

    # (2) Shared 1x1 conv (BN scale folded into w1) + BN bias + ReLU, batched over nb.
    w1b = jnp.broadcast_to(w1_ref[...], (nb, mid, C))
    y = jnp.einsum("nmc,nck->nmk", w1b, pooled3,
                   preferred_element_type=jnp.float32)            # (nb, mid, K)
    z = jnp.maximum(y + bias_ref[...], 0.0)

    # (3) F_h / F_w fused into a single matmul + single sigmoid (EUP).
    whwb = jnp.broadcast_to(whw_ref[...], (nb, 2 * C, mid))
    s = jax.nn.sigmoid(jnp.einsum("ncm,nmk->nck", whwb, z,
                                  preferred_element_type=jnp.float32))  # (nb, 2C, K)
    sh = s[:, :C, :].reshape(nbc, k)                  # sublane-aligned split (C % 8 == 0)
    sw = s[:, C:, :].reshape(nbc, k)

    # (4) Gate expansion back to the flat spatial axis: two lane-dense MXU matmuls.
    #     eh/ew are 0/1 selection matrices so casting sh/sw to the operand dtype
    #     (bf16 when x is bf16) only rounds the sigmoid values, never the selection.
    eh = eh_ref[...]
    ew = ew_ref[...]
    gate = (jnp.dot(sh.astype(eh.dtype), eh, preferred_element_type=jnp.float32) *
            jnp.dot(sw.astype(ew.dtype), ew, preferred_element_type=jnp.float32))

    out_ref[...] = (xb * gate.astype(xb.dtype)).astype(out_ref.dtype)  # lane-dense store


def _tpu_vmem_capacity_bytes():
    try:
        return int(pltpu.get_tpu_info().vmem_capacity_bytes)
    except Exception:
        return 64 << 20   # conservative fallback: v7x per-TensorCore VMEM


def _padded_tile_bytes(shape, itemsize):
    # VMEM footprint of one buffer, padded to (8, 128) tiles on the minor dims.
    rows = shape[-2] if len(shape) >= 2 else 1
    cols = shape[-1]
    lead = 1
    for d in shape[:-2]:
        lead *= d
    rows_p = -(-rows // 8) * 8
    cols_p = -(-cols // 128) * 128
    return lead * rows_p * cols_p * itemsize


def _pick_block_n(N, per_batch_bytes, budget_bytes, min_grid_steps=4):
    # Largest nb that (a) divides N, (b) fits the VMEM block budget, and
    # (c) leaves >= min_grid_steps grid steps when N is large enough so both
    # v7x TensorCores stay busy on the "parallel" grid axis.
    max_nb = max(1, budget_bytes // max(per_batch_bytes, 1))
    if N >= 2 * min_grid_steps:
        max_nb = min(max_nb, N // min_grid_steps)
    nb = max(1, min(N, max_nb))
    while N % nb:   # TODO(synk): cdiv grid + masked tail for ragged batch counts
        nb -= 1
    return nb


def ca_block(x, w1, wh, ww, bn_gamma, bn_beta, bn_mean, bn_var, eps=1e-5):
    N, C, H, W = x.shape
    mid = w1.shape[0]
    HW = H * W
    K = H + W
    f32 = jnp.float32
    assert C % 8 == 0, "internal channel count must be sublane-aligned"

    # Fold eval-mode BatchNorm: scale into the shared 1x1-conv weight, keep bias.
    gamma = bn_gamma.astype(f32)
    inv_std = 1.0 / jnp.sqrt(bn_var.astype(f32) + eps)
    scale = gamma * inv_std                                       # (mid,)
    w1s = w1.astype(f32) * scale[:, None]                         # (mid, C)
    bias = bn_beta.astype(f32) - bn_mean.astype(f32) * scale      # (mid,)
    bias_k = jnp.broadcast_to(bias[:, None], (mid, K))            # (mid, K)

    # F_h / F_w stacked so the gate stage is one matmul + one sigmoid.
    whw = jnp.concatenate([wh.astype(f32), ww.astype(f32)], axis=0)   # (2C, mid)

    # Constant pooling / expansion matrices; MXU operand dtype follows x
    # (bf16 x -> bf16 operands, f32 x -> native f32 multi-pass for accuracy).
    op_dtype = jnp.bfloat16 if x.dtype == jnp.bfloat16 else f32
    row_idx = jnp.arange(HW) // W           # h of each flat spatial position
    col_idx = jnp.arange(HW) % W            # w of each flat spatial position
    k_idx = jnp.arange(K)
    eh_f = (k_idx[:, None] == row_idx[None, :]).astype(f32)          # (K, HW)
    ew_f = (k_idx[:, None] == (H + col_idx)[None, :]).astype(f32)    # (K, HW)
    pool = ((eh_f / W + ew_f / H).T).astype(op_dtype)                # (HW, K)
    eh = eh_f.astype(op_dtype)
    ew = ew_f.astype(op_dtype)

    x_flat = x.reshape(N * C, HW)
    itemsize = jnp.dtype(x.dtype).itemsize
    per_batch_bytes = C * HW * itemsize
    op_itemsize = jnp.dtype(op_dtype).itemsize

    # Generation-aware VMEM budgeting (v7x: 64 MiB physical, v5e/v6e: 128 MiB).
    vmem_cap = _tpu_vmem_capacity_bytes()
    resident_target = (24 << 20) if vmem_cap <= (64 << 20) else (48 << 20)
    aux_bytes = (_padded_tile_bytes((HW, K), op_itemsize)
                 + _padded_tile_bytes((K, HW), op_itemsize) * 2
                 + _padded_tile_bytes((mid, C), 4)
                 + _padded_tile_bytes((mid, K), 4)
                 + _padded_tile_bytes((2 * C, mid), 4))
    block_budget = max(1 << 20, (resident_target - 2 * aux_bytes) // 4)
    nb = _pick_block_n(N, per_batch_bytes, block_budget)
    block_bytes = nb * per_batch_bytes
    # in + out blocks are double-buffered by the pipeline (~4x block bytes resident).
    vmem_limit = int(min(resident_target + (8 << 20),
                         max(16 << 20, 4 * block_bytes + 2 * aux_bytes + (4 << 20))))

    # Advisory cost estimate for the XLA scheduler.
    flops = int(N * (2 * C * HW * K            # pooling matmul
                     + 2 * mid * C * K         # shared 1x1 conv
                     + 2 * 2 * C * mid * K     # fused F_h / F_w
                     + 2 * 2 * C * K * HW      # gate expansion
                     + 4 * C * HW))            # elementwise gating
    transcendentals = int(N * 2 * C * K)
    bytes_accessed = int(2 * N * C * HW * itemsize + aux_bytes)

    grid = (N // nb,)
    out_flat = pl.pallas_call(
        ca_block_kernel,
        out_shape=jax.ShapeDtypeStruct((N * C, HW), x.dtype),
        grid=grid,
        in_specs=[
            # TODO(synk): if DMA is still exposed after block enlargement, add
            # pipeline_mode=pl.Buffered(3) on this x spec (budget one extra block).
            pl.BlockSpec((nb * C, HW), lambda i: (i, 0)),
            pl.BlockSpec((HW, K), lambda i: (0, 0)),
            pl.BlockSpec((mid, C), lambda i: (0, 0)),
            pl.BlockSpec((mid, K), lambda i: (0, 0)),
            pl.BlockSpec((2 * C, mid), lambda i: (0, 0)),
            pl.BlockSpec((K, HW), lambda i: (0, 0)),
            pl.BlockSpec((K, HW), lambda i: (0, 0)),
        ],
        out_specs=pl.BlockSpec((nb * C, HW), lambda i: (i, 0)),
        compiler_params=pltpu.CompilerParams(
            dimension_semantics=("parallel",),
            vmem_limit_bytes=vmem_limit,
        ),
        cost_estimate=pl.CostEstimate(
            flops=flops, transcendentals=transcendentals, bytes_accessed=bytes_accessed),
    )(x_flat, pool, w1s, bias_k, whw, eh, ew)

    return out_flat.reshape(N, C, H, W)


def ca_block_ref(x, w1, wh, ww, bn_gamma, bn_beta, bn_mean, bn_var, eps=1e-5):
    # Pure-JAX reference mirroring the PyTorch forward (eval-mode BN).
    mid = w1.shape[0]
    inv_std = 1.0 / jnp.sqrt(bn_var + eps)
    scale = (bn_gamma * inv_std).reshape(1, mid, 1)
    bias = (bn_beta - bn_mean * bn_gamma * inv_std).reshape(1, mid, 1)

    x_h = jnp.mean(x, axis=3)                      # (N, C, H)
    x_w = jnp.mean(x, axis=2)                      # (N, C, W)
    y_h = jnp.einsum("mc,nch->nmh", w1, x_h)
    y_w = jnp.einsum("mc,ncw->nmw", w1, x_w)
    z_h = jax.nn.relu(y_h * scale + bias)
    z_w = jax.nn.relu(y_w * scale + bias)
    s_h = jax.nn.sigmoid(jnp.einsum("cm,nmh->nch", wh, z_h))   # (N, C, H)
    s_w = jax.nn.sigmoid(jnp.einsum("cm,nmw->ncw", ww, z_w))   # (N, C, W)
    return x * s_h[:, :, :, None] * s_w[:, :, None, :]


if __name__ == "__main__":
    # Module constructed as CA_Block(channel=64, reduction=16) => internal C=32, mid=2.
    N, C, H, W = 2, 32, 16, 16
    reduction = 16
    mid = C // reduction  # = 2

    key = jax.random.PRNGKey(0)
    kx, k1, k2, k3, k4, k5, k6, k7 = jax.random.split(key, 8)

    x = jax.random.normal(kx, (N, C, H, W), dtype=jnp.float32)

    # conv_1x1: (mid, C, 1, 1) -> (mid, C);  F_h / F_w: (C, mid, 1, 1) -> (C, mid)
    w1 = jax.random.normal(k1, (mid, C), dtype=jnp.float32) * 0.2
    wh = jax.random.normal(k2, (C, mid), dtype=jnp.float32) * 0.2
    ww = jax.random.normal(k3, (C, mid), dtype=jnp.float32) * 0.2

    # BatchNorm2d(mid) parameters (eval-mode / running statistics)
    bn_gamma = 0.5 + jax.random.uniform(k4, (mid,), dtype=jnp.float32)
    bn_beta = jax.random.normal(k5, (mid,), dtype=jnp.float32) * 0.1
    bn_mean = jax.random.normal(k6, (mid,), dtype=jnp.float32) * 0.1
    bn_var = 0.5 + jax.random.uniform(k7, (mid,), dtype=jnp.float32)

    # float32 I/O (native f32 matmuls in-kernel)
    out = jax.block_until_ready(ca_block(x, w1, wh, ww, bn_gamma, bn_beta, bn_mean, bn_var))
    ref = ca_block_ref(x, w1, wh, ww, bn_gamma, bn_beta, bn_mean, bn_var)
    assert out.shape == (N, C, H, W)
    assert jnp.allclose(out, ref, atol=1e-4, rtol=1e-4)

    # bf16 I/O (bf16 MXU operands, f32 accumulation; bf16 stores)
    x_bf16 = x.astype(jnp.bfloat16)
    out_bf16 = jax.block_until_ready(
        ca_block(x_bf16, w1, wh, ww, bn_gamma, bn_beta, bn_mean, bn_var))
    ref_bf16 = ca_block_ref(x_bf16.astype(jnp.float32), w1, wh, ww,
                            bn_gamma, bn_beta, bn_mean, bn_var)
    assert out_bf16.dtype == jnp.bfloat16
    assert float(jnp.max(jnp.abs(out_bf16.astype(jnp.float32) - ref_bf16))) < 5e-2

    print("KERNEL_OK")
</pallas_src>

<mosaic_0001>
module attributes {stable_mosaic.version = 11 : i64} {
  func.func @ca_block_kernel(%arg0: i32, %arg1: memref<64x256xf32, #tpu.memory_space<vmem>>, %arg2: memref<256x32xf32, #tpu.memory_space<vmem>>, %arg3: memref<2x32xf32, #tpu.memory_space<vmem>>, %arg4: memref<2x32xf32, #tpu.memory_space<vmem>>, %arg5: memref<64x2xf32, #tpu.memory_space<vmem>>, %arg6: memref<32x256xf32, #tpu.memory_space<vmem>>, %arg7: memref<32x256xf32, #tpu.memory_space<vmem>>, %arg8: memref<64x256xf32, #tpu.memory_space<vmem>>) attributes {dimension_semantics = [#tpu.dimension_semantics<parallel>], iteration_bounds = array<i64: 1>, scalar_prefetch = 0 : i64, scratch_operands = 0 : i64, tpu.core_type = #tpu.core_type<tc>, window_params = [{transform_indices = @transform_0, window_bounds = array<i64: 64, 256>}, {pipeline_mode = #tpu.pipeline_mode<synchronous>, transform_indices = @transform_1, window_bounds = array<i64: 256, 32>}, {pipeline_mode = #tpu.pipeline_mode<synchronous>, transform_indices = @transform_2, window_bounds = array<i64: 2, 32>}, {pipeline_mode = #tpu.pipeline_mode<synchronous>, transform_indices = @transform_3, window_bounds = array<i64: 2, 32>}, {pipeline_mode = #tpu.pipeline_mode<synchronous>, transform_indices = @transform_4, window_bounds = array<i64: 64, 2>}, {pipeline_mode = #tpu.pipeline_mode<synchronous>, transform_indices = @transform_5, window_bounds = array<i64: 32, 256>}, {pipeline_mode = #tpu.pipeline_mode<synchronous>, transform_indices = @transform_6, window_bounds = array<i64: 32, 256>}, {transform_indices = @transform_7, window_bounds = array<i64: 64, 256>}]} {
    %c0 = arith.constant 0 : index
    %c0_0 = arith.constant 0 : index
    %0 = vector.load %arg1[%c0, %c0_0] : memref<64x256xf32, #tpu.memory_space<vmem>>, vector<64x256xf32>
    %c0_1 = arith.constant 0 : index
    %c0_2 = arith.constant 0 : index
    %1 = vector.load %arg2[%c0_1, %c0_2] : memref<256x32xf32, #tpu.memory_space<vmem>>, vector<256x32xf32>
    %cst = arith.constant dense<0.000000e+00> : vector<64x32xf32>
    %2 = tpu.matmul %0, %1, %cst {dimension_numbers = #tpu.dot_dimension_numbers<[1], [0], [0], [1], [0, 0, 1, 1], [], []>} : vector<64x256xf32>, vector<256x32xf32>, vector<64x32xf32> -> vector<64x32xf32>
    %3 = vector.shape_cast %2 : vector<64x32xf32> to vector<2x32x32xf32>
    %c0_3 = arith.constant 0 : index
    %c0_4 = arith.constant 0 : index
    %4 = vector.load %arg3[%c0_3, %c0_4] : memref<2x32xf32, #tpu.memory_space<vmem>>, vector<2x32xf32>
    %5 = vector.shape_cast %4 : vector<2x32xf32> to vector<1x2x32xf32>
    %6 = vector.broadcast %5 : vector<1x2x32xf32> to vector<2x2x32xf32>
    "tpu.trace_start"() <{level = 10 : i32, message = "nmc,nck->nmk"}> : () -> ()
    %cst_5 = arith.constant dense<0.000000e+00> : vector<2x2x32xf32>
    %7 = tpu.matmul %6, %3, %cst_5 {dimension_numbers = #tpu.dot_dimension_numbers<[2], [1], [1], [2], [0, 0, 0, 1, 1, 2], [0], [0]>} : vector<2x2x32xf32>, vector<2x32x32xf32>, vector<2x2x32xf32> -> vector<2x2x32xf32>
    "tpu.trace_stop"() : () -> ()
    %c0_6 = arith.constant 0 : index
    %c0_7 = arith.constant 0 : index
    %8 = vector.load %arg4[%c0_6, %c0_7] : memref<2x32xf32, #tpu.memory_space<vmem>>, vector<2x32xf32>
    %9 = vector.shape_cast %8 : vector<2x32xf32> to vector<1x2x32xf32>
    %10 = vector.broadcast %9 : vector<1x2x32xf32> to vector<2x2x32xf32>
    %11 = arith.addf %7, %10 : vector<2x2x32xf32>
    %cst_8 = arith.constant 0.000000e+00 : f32
    %12 = vector.broadcast %cst_8 : f32 to vector<2x2x32xf32>
    %13 = arith.maximumf %11, %12 : vector<2x2x32xf32>
    %c0_9 = arith.constant 0 : index
    %c0_10 = arith.constant 0 : index
    %14 = vector.load %arg5[%c0_9, %c0_10] : memref<64x2xf32, #tpu.memory_space<vmem>>, vector<64x2xf32>
    %15 = vector.shape_cast %14 : vector<64x2xf32> to vector<1x64x2xf32>
    %16 = vector.broadcast %15 : vector<1x64x2xf32> to vector<2x64x2xf32>
    "tpu.trace_start"() <{level = 10 : i32, message = "ncm,nmk->nck"}> : () -> ()
    %cst_11 = arith.constant dense<0.000000e+00> : vector<2x64x32xf32>
    %17 = tpu.matmul %16, %13, %cst_11 {dimension_numbers = #tpu.dot_dimension_numbers<[2], [1], [1], [2], [0, 0, 0, 1, 1, 2], [0], [0]>} : vector<2x64x2xf32>, vector<2x2x32xf32>, vector<2x64x32xf32> -> vector<2x64x32xf32>
    "tpu.trace_stop"() : () -> ()
    %18 = arith.negf %17 : vector<2x64x32xf32>
    %19 = math.exp %18 : vector<2x64x32xf32>
    %cst_12 = arith.constant 1.000000e+00 : f32
    %20 = vector.broadcast %cst_12 : f32 to vector<2x64x32xf32>
    %21 = arith.addf %20, %19 : vector<2x64x32xf32>
    %22 = arith.divf %20, %21 : vector<2x64x32xf32>
    %23 = vector.extract_strided_slice %22 {offsets = [0, 0, 0], sizes = [2, 32, 32], strides = [1, 1, 1]} : vector<2x64x32xf32> to vector<2x32x32xf32>
    %24 = vector.shape_cast %23 : vector<2x32x32xf32> to vector<64x32xf32>
    %25 = vector.extract_strided_slice %22 {offsets = [0, 32, 0], sizes = [2, 32, 32], strides = [1, 1, 1]} : vector<2x64x32xf32> to vector<2x32x32xf32>
    %26 = vector.shape_cast %25 : vector<2x32x32xf32> to vector<64x32xf32>
    %c0_13 = arith.constant 0 : index
    %c0_14 = arith.constant 0 : index
    %27 = vector.load %arg6[%c0_13, %c0_14] : memref<32x256xf32, #tpu.memory_space<vmem>>, vector<32x256xf32>
    %c0_15 = arith.constant 0 : index
    %c0_16 = arith.constant 0 : index
    %28 = vector.load %arg7[%c0_15, %c0_16] : memref<32x256xf32, #tpu.memory_space<vmem>>, vector<32x256xf32>
    %cst_17 = arith.constant dense<0.000000e+00> : vector<64x256xf32>
    %29 = tpu.matmul %24, %27, %cst_17 {dimension_numbers = #tpu.dot_dimension_numbers<[1], [0], [0], [1], [0, 0, 1, 1], [], []>} : vector<64x32xf32>, vector<32x256xf32>, vector<64x256xf32> -> vector<64x256xf32>
    %cst_18 = arith.constant dense<0.000000e+00> : vector<64x256xf32>
    %30 = tpu.matmul %26, %28, %cst_18 {dimension_numbers = #tpu.dot_dimension_numbers<[1], [0], [0], [1], [0, 0, 1, 1], [], []>} : vector<64x32xf32>, vector<32x256xf32>, vector<64x256xf32> -> vector<64x256xf32>
    %31 = arith.mulf %29, %30 : vector<64x256xf32>
    %32 = arith.mulf %0, %31 : vector<64x256xf32>
    %c0_19 = arith.constant 0 : index
    %c0_20 = arith.constant 0 : index
    %33 = vector.load %arg8[%c0_19, %c0_20] : memref<64x256xf32, #tpu.memory_space<vmem>>, vector<64x256xf32>
    tpu.vector_store %arg8[%c0_19, %c0_20], %32 {strides = array<i32>} : memref<64x256xf32, #tpu.memory_space<vmem>>, vector<64x256xf32>,
    return
  }
  func.func @transform_0(%arg0: i32) -> (i32, i32) {
    %c0_i32 = arith.constant 0 : i32
    %c0_i32_0 = arith.constant 0 : i32
    return %arg0, %c0_i32 : i32, i32
  }
  func.func @transform_1(%arg0: i32) -> (i32, i32) {
    %c0_i32 = arith.constant 0 : i32
    %c0_i32_0 = arith.constant 0 : i32
    %c0_i32_1 = arith.constant 0 : i32
    return %c0_i32, %c0_i32_0 : i32, i32
  }
  func.func @transform_2(%arg0: i32) -> (i32, i32) {
    %c0_i32 = arith.constant 0 : i32
    %c0_i32_0 = arith.constant 0 : i32
    %c0_i32_1 = arith.constant 0 : i32
    return %c0_i32, %c0_i32_0 : i32, i32
  }
  func.func @transform_3(%arg0: i32) -> (i32, i32) {
    %c0_i32 = arith.constant 0 : i32
    %c0_i32_0 = arith.constant 0 : i32
    %c0_i32_1 = arith.constant 0 : i32
    return %c0_i32, %c0_i32_0 : i32, i32
  }
  func.func @transform_4(%arg0: i32) -> (i32, i32) {
    %c0_i32 = arith.constant 0 : i32
    %c0_i32_0 = arith.constant 0 : i32
    %c0_i32_1 = arith.constant 0 : i32
    return %c0_i32, %c0_i32_0 : i32, i32
  }
  func.func @transform_5(%arg0: i32) -> (i32, i32) {
    %c0_i32 = arith.constant 0 : i32
    %c0_i32_0 = arith.constant 0 : i32
    %c0_i32_1 = arith.constant 0 : i32
    return %c0_i32, %c0_i32_0 : i32, i32
  }
  func.func @transform_6(%arg0: i32) -> (i32, i32) {
    %c0_i32 = arith.constant 0 : i32
    %c0_i32_0 = arith.constant 0 : i32
    %c0_i32_1 = arith.constant 0 : i32
    return %c0_i32, %c0_i32_0 : i32, i32
  }
  func.func @transform_7(%arg0: i32) -> (i32, i32) {
    %c0_i32 = arith.constant 0 : i32
    %c0_i32_0 = arith.constant 0 : i32
    return %arg0, %c0_i32 : i32, i32
  }
}

</mosaic_0001>

<bundles_post_ra>
// kernel: tpu_custom_call.1
= control target key start
LH: loop header
LB: loop body
LE: loop exit
PB: predicated region body
PF: predicated region fallthrough
CT: control target
= control target key end

     0   :  { %s1608_s0 = inlined_call_operand.vmem [shape: f32[64,256], index: 0, kind: input, shape index: {}]   ;;  %s1609_s1 = inlined_call_operand.vmem [shape: f32[256,32], index: 1, kind: input, shape index: {}]   ;;  %s1610_s2 = inlined_call_operand.vmem [shape: f32[2,32], index: 2, kind: input, shape index: {}]   ;;  %s1611_s3 = inlined_call_operand.vmem [shape: f32[2,32], index: 3, kind: input, shape index: {}]   ;;  %s1612_s4 = inlined_call_operand.vmem [shape: f32[64,2], index: 4, kind: input, shape index: {}]   ;;  %s1613_s5 = inlined_call_operand.vmem [shape: f32[32,256], index: 5, kind: input, shape index: {}]   ;;  %s1614_s6 = inlined_call_operand.vmem [shape: f32[32,256], index: 6, kind: input, shape index: {}]   ;;  %s1615_s7 = inlined_call_operand.hbm [shape: f32[64,256], index: 7, kind: output, shape index: {}]  }
   0x1   :  { %v58_v0 = vld [vmem:[%s1609_s1 + $0x78] sm:$0xff]  ;;  %v57_v2 = vld [vmem:[%s1609_s1 + $0x70] sm:$0xff]  ;;  %v56_v4 = vld [vmem:[%s1609_s1 + $0x68] sm:$0xff] }
   0x2   :  { %v74_v1 = vld [vmem:[%s1609_s1 + $0xf8] sm:$0xff]  ;;  %75 = vmatpush.msra.mxu0 %v58_v0  ;;  %v73_v3 = vld [vmem:[%s1609_s1 + $0xf0] sm:$0xff]  ;;  %v72_v5 = vld [vmem:[%s1609_s1 + $0xe8] sm:$0xff] }
   0x3   :  { %116 = vmatpush.msra.mxu1 %v74_v1  ;;  %v55_v6 = vld [vmem:[%s1609_s1 + $0x60] sm:$0xff]  ;;  %v54_v8 = vld [vmem:[%s1609_s1 + $0x58] sm:$0xff]  ;;  %v53_v10 = vld [vmem:[%s1609_s1 + $0x50] sm:$0xff] }
   0x4   :  { %76 = vmatpush.msra.mxu0 %v57_v2  ;;  %v71_v7 = vld [vmem:[%s1609_s1 + $0xe0] sm:$0xff]  ;;  %v70_v9 = vld [vmem:[%s1609_s1 + $0xd8] sm:$0xff]  ;;  %v69_v11 = vld [vmem:[%s1609_s1 + $0xd0] sm:$0xff] }
   0x5   :  { %117 = vmatpush.msra.mxu1 %v73_v3  ;;  %v52_v12 = vld [vmem:[%s1609_s1 + $0x48] sm:$0xff]  ;;  %v51_v14 = vld [vmem:[%s1609_s1 + $0x40] sm:$0xff] }
   0x6   :  { %77 = vmatpush.msra.mxu0 %v56_v4  ;;  %v68_v13 = vld [vmem:[%s1609_s1 + $0xc8] sm:$0xff]  ;;  %v67_v15 = vld [vmem:[%s1609_s1 + $0xc0] sm:$0xff] }
   0x7   :  { %118 = vmatpush.msra.mxu1 %v72_v5 }
   0x8   :  { %78 = vmatpush.msra.mxu0 %v55_v6 }
   0x9   :  { %119 = vmatpush.msra.mxu1 %v71_v7 }
   0xa   :  { %79 = vmatpush.msra.mxu0 %v54_v8 }
   0xb   :  { %120 = vmatpush.msra.mxu1 %v70_v9 }
   0xc   :  { %80 = vmatpush.msra.mxu0 %v53_v10 }
   0xd   :  { %121 = vmatpush.msra.mxu1 %v69_v11 }
   0xe   :  { %12 = vsyncpa [#allocation3], 0  ;;  %81 = vmatpush.msra.mxu0 %v52_v12  ;;  %v50_v16 = vld [vmem:[%s1609_s1 + $0x38] sm:$0xff]  ;;  %v49_v18 = vld [vmem:[%s1609_s1 + $0x30] sm:$0xff]  ;;  %vm159_vm0 = vcmask 261120   ;;  %vm238_vm1 = vcmask 1041408  }
   0xf   :  { %122 = vmatpush.msra.mxu1 %v68_v13  ;;  %v66_v17 = vld [vmem:[%s1609_s1 + $0xb8] sm:$0xff]  ;;  %v65_v19 = vld [vmem:[%s1609_s1 + $0xb0] sm:$0xff]  ;;  %v48_v20 = vld [vmem:[%s1609_s1 + $0x28] sm:$0xff]  ;;  %vm213_vm2 = vcmask 15360   ;;  %s1106_s16 = smov [#allocation2]   ;;  %s913_s20 = sshll.u32 %s1615_s7, 4  ;;  %s914_s20 = int_to_ptr.hbm [resolvable:$true] %s913_s20 }
  0x10   :  { %82 = vmatpush.msra.mxu0 %v51_v14  ;;  %v64_v21 = vld [vmem:[%s1609_s1 + $0xa8] sm:$0xff]  ;;  %v47_v22 = vld [vmem:[%s1609_s1 + $0x20] sm:$0xff]  ;;  %v46_v24 = vld [vmem:[%s1609_s1 + $0x18] sm:$0xff]  ;;  %s911_s17 = sshll.u32 %s1106_s16, 4  ;;  %s912_s17 = int_to_ptr.vmem [resolvable:$true] %s911_s17 }
  0x11   :  { %123 = vmatpush.msra.mxu1 %v67_v15  ;;  %v63_v23 = vld [vmem:[%s1609_s1 + $0xa0] sm:$0xff]  ;;  %v62_v25 = vld [vmem:[%s1609_s1 + $0x98] sm:$0xff]  ;;  %v45_v26 = vld [vmem:[%s1609_s1 + $0x10] sm:$0xff] }
  0x12   :  { %83 = vmatpush.msra.mxu0 %v50_v16  ;;  %v61_v27 = vld [vmem:[%s1609_s1 + $0x90] sm:$0xff]  ;;  %v44_v28 = vld [vmem:[%s1609_s1 + $0x8] sm:$0xff]  ;;  %v43_v30 = vld [vmem:[%s1609_s1] sm:$0xff] }
  0x13   :  { %124 = vmatpush.msra.mxu1 %v66_v17  ;;  %v60_v29 = vld [vmem:[%s1609_s1 + $0x88] sm:$0xff]  ;;  %v59_v31 = vld [vmem:[%s1609_s1 + $0x80] sm:$0xff]  ;;  %v1260_v34 = vld [vmem:[%s1608_s0 + $0x10] sm:$0xff] }
  0x14   :  { %84 = vmatpush.msra.mxu0 %v49_v18  ;;  %v1248_v32 = vld [vmem:[%s1608_s0] sm:$0xff]  ;;  %v1253_v33 = vld [vmem:[%s1608_s0 + $0x8] sm:$0xff]  ;;  %v1265_v35 = vld [vmem:[%s1608_s0 + $0x18] sm:$0xff] }
  0x15   :  { %125 = vmatpush.msra.mxu1 %v65_v19  ;;  %v31_v36 = vld [vmem:[%s1608_s0 + $0x20] sm:$0xff]  ;;  %v32_v37 = vld [vmem:[%s1608_s0 + $0x28] sm:$0xff]  ;;  %v33_v38 = vld [vmem:[%s1608_s0 + $0x30] sm:$0xff] }
  0x16   :  { %85 = vmatpush.msra.mxu0 %v48_v20  ;;  %v34_v39 = vld [vmem:[%s1608_s0 + $0x38] sm:$0xff]  ;;  %v35_v40 = vld [vmem:[%s1608_s0 + $0x40] sm:$0xff]  ;;  %v36_v41 = vld [vmem:[%s1608_s0 + $0x48] sm:$0xff] }
  0x17   :  { %126 = vmatpush.msra.mxu1 %v64_v21  ;;  %v37_v42 = vld [vmem:[%s1608_s0 + $0x50] sm:$0xff]  ;;  %v38_v43 = vld [vmem:[%s1608_s0 + $0x58] sm:$0xff]  ;;  %v39_v44 = vld [vmem:[%s1608_s0 + $0x60] sm:$0xff] }
  0x18   :  { %86 = vmatpush.msra.mxu0 %v47_v22  ;;  %v40_v45 = vld [vmem:[%s1608_s0 + $0x68] sm:$0xff]  ;;  %v41_v46 = vld [vmem:[%s1608_s0 + $0x70] sm:$0xff]  ;;  %v42_v47 = vld [vmem:[%s1608_s0 + $0x78] sm:$0xff] }
  0x19   :  { %127 = vmatpush.msra.mxu1 %v63_v23  ;;  %v157_v60 = vld [vmem:[%s1610_s2] sm:$0x3]  ;;  %v206_v14 = vld [vmem:[%s1612_s4 + $0x8] sm:$0xff]  ;;  %v207_v15 = vld [vmem:[%s1612_s4 + $0x10] sm:$0xff] }
  0x1a   :  { %87 = vmatpush.msra.mxu0 %v46_v24  ;;  %v158_v9 = vld [vmem:[%s1611_s3] sm:$0x3]  ;;  %v208_v16 = vld [vmem:[%s1612_s4 + $0x18] sm:$0xff]  ;;  %v210_v21 = vld [vmem:[%s1612_s4 + $0x28] sm:$0xff] }
  0x1b   :  { %128 = vmatpush.msra.mxu1 %v62_v25  ;;  %v205_v13 = vld [vmem:[%s1612_s4] sm:$0xff]  ;;  %v211_v22 = vld [vmem:[%s1612_s4 + $0x30] sm:$0xff]  ;;  %v212_v23 = vld [vmem:[%s1612_s4 + $0x38] sm:$0xff] }
  0x1c   :  { %88 = vmatpush.msra.mxu0 %v45_v26  ;;  %v209_v20 = vld [vmem:[%s1612_s4 + $0x20] sm:$0xff]  ;;  %v637_v24 = vld [vmem:[%s1613_s5 + $0x30] sm:$0xff]  ;;  %v638_v25 = vld [vmem:[%s1613_s5 + $0x38] sm:$0xff]  ;;  %s1108_s4 = smov 16  }
  0x1d   :  { %129 = vmatpush.msra.mxu1 %v61_v27  ;;  %v635_v26 = vld [vmem:[%s1613_s5 + $0x20] sm:$0xff]  ;;  %v636_v27 = vld [vmem:[%s1613_s5 + $0x28] sm:$0xff] }
  0x1e   :  { %89 = vmatpush.msra.mxu0 %v44_v28  ;;  %v633_v28 = vld [vmem:[%s1613_s5 + $0x10] sm:$0xff] }
  0x1f   :  { %130 = vmatpush.msra.mxu1 %v60_v29  ;;  %v634_v29 = vld [vmem:[%s1613_s5 + $0x18] sm:$0xff] }
  0x20   :  { %90 = vmatpush.msra.mxu0 %v43_v30  ;;  %v631_v30 = vld [vmem:[%s1613_s5] sm:$0xff] }
  0x21   :  { %131 = vmatpush.msra.mxu1 %v59_v31  ;;  %91 = vmatmul.f32.vlgmr.msra.gmra.mxu0 %v1248_v32  ;;  %v632_v31 = vld [vmem:[%s1613_s5 + $0x8] sm:$0xff] }
  0x22   :  { %132 = vmatmul.f32.vlgmr.msra.gmra.mxu1 %v1253_v33 }
  0x29   :  { %94 = vmatmul.f32.gmra.mxu0 %v1260_v34 }
  0x2a   :  { %135 = vmatmul.f32.gmra.mxu1 %v1265_v35 }
  0x31   :  { %97 = vmatmul.f32.gmra.mxu0 %v31_v36  ;;  %v645_v36 = vld [vmem:[%s1614_s6 + $0x30] sm:$0xff] }
  0x32   :  { %138 = vmatmul.f32.gmra.mxu1 %v32_v37  ;;  %v646_v37 = vld [vmem:[%s1614_s6 + $0x38] sm:$0xff]  ;;  %789 = vmatpush.msrb.mxu0 %v645_v36 }
  0x33   :  { %830 = vmatpush.msrb.mxu1 %v646_v37 }
  0x39   :  { %100 = vmatmul.f32.gmra.mxu0 %v33_v38 }
  0x3a   :  { %141 = vmatmul.f32.gmra.mxu1 %v34_v39 }
  0x41   :  { %103 = vmatmul.f32.gmra.mxu0 %v35_v40 }
  0x42   :  { %144 = vmatmul.f32.gmra.mxu1 %v36_v41 }
  0x49   :  { %106 = vmatmul.f32.gmra.mxu0 %v37_v42 }
  0x4a   :  { %147 = vmatmul.f32.gmra.mxu1 %v38_v43 }
  0x51   :  { %109 = vmatmul.f32.gmra.mxu0 %v39_v44  ;;  %v643_v44 = vld [vmem:[%s1614_s6 + $0x20] sm:$0xff] }
  0x52   :  { %150 = vmatmul.f32.gmra.mxu1 %v40_v45  ;;  %v644_v45 = vld [vmem:[%s1614_s6 + $0x28] sm:$0xff]  ;;  %790 = vmatpush.msrb.mxu0 %v643_v44 }
  0x53   :  { %831 = vmatpush.msrb.mxu1 %v644_v45 }
  0x59   :  { %112 = vmatmul.f32.gmra.mxu0 %v41_v46 }
  0x5a   :  { %153 = vmatmul.f32.gmra.mxu1 %v42_v47 }
  0x9e   :  { %v92_v48 = vpop.f32.mrf.mxu0 }
  0x9f   :  { %v133_v49 = vpop.f32.mrf.mxu1 }
  0xa0   :  { %v134_v59 = vadd.f32 %v133_v49, %v92_v48 }
  0xa6   :  { %v95_v50 = vpop.f32.mrf.mxu0 }
  0xa7   :  { %v136_v51 = vpop.f32.mrf.mxu1 }
  0xa8   :  { %v137_v58 = vadd.f32 %v136_v51, %v95_v50 }
  0xae   :  { %v98_v52 = vpop.f32.mrf.mxu0 }
  0xaf   :  { %v139_v53 = vpop.f32.mrf.mxu1 }
  0xb0   :  { %v140_v57 = vadd.f32 %v139_v53, %v98_v52 }
  0xb6   :  { %v101_v54 = vpop.f32.mrf.mxu0 }
  0xb7   :  { %v142_v55 = vpop.f32.mrf.mxu1 }
  0xb8   :  { %v143_v56 = vadd.f32 %v142_v55, %v101_v54 }
  0xba   :  { %175 = vmatpush.msra.mxu2 %v143_v56 }
  0xbc   :  { %176 = vmatpush.msra.mxu2 %v140_v57 }
  0xbe   :  { %177 = vmatpush.msra.mxu2 %v137_v58  ;;  %v104_v61 = vpop.f32.mrf.mxu0 }
  0xbf   :  { %v145_v62 = vpop.f32.mrf.mxu1 }
  0xc0   :  { %178 = vmatpush.msra.mxu2 %v134_v59  ;;  %v146_v8 = vadd.f32 %v145_v62, %v104_v61 }
  0xc1   :  { %925 = vmatmul.msk.f32.vlgmr.msra.gmra.mxu2 %vm159_vm0, %v157_v60 }
  0xc6   :  { %v107_v63 = vpop.f32.mrf.mxu0 }
  0xc7   :  { %v148_v0 = vpop.f32.mrf.mxu1 }
  0xc8   :  { %v149_v7 = vadd.f32 %v148_v0, %v107_v63 }
  0xce   :  { %v110_v1 = vpop.f32.mrf.mxu0 }
  0xcf   :  { %v151_v2 = vpop.f32.mrf.mxu1 }
  0xd0   :  { %v152_v6 = vadd.f32 %v151_v2, %v110_v1  ;;  %v641_v1 = vld [vmem:[%s1614_s6 + $0x10] sm:$0xff]  ;;  %v642_v2 = vld [vmem:[%s1614_s6 + $0x18] sm:$0xff] }
  0xd1   :  { %791 = vmatpush.msrb.mxu0 %v641_v1  ;;  %832 = vmatpush.msrb.mxu1 %v642_v2 }
  0xd6   :  { %v113_v3 = vpop.f32.mrf.mxu0 }
  0xd7   :  { %v154_v4 = vpop.f32.mrf.mxu1 }
  0xd8   :  { %v155_v5 = vadd.f32 %v154_v4, %v113_v3 }
  0xda   :  { %195 = vmatpush.msra.mxu3 %v155_v5 }
  0xdc   :  { %196 = vmatpush.msra.mxu3 %v152_v6 }
  0xde   :  { %197 = vmatpush.msra.mxu3 %v149_v7  ;;  %v639_v7 = vld [vmem:[%s1614_s6] sm:$0xff] }
  0xdf   :  { %792 = vmatpush.msrb.mxu0 %v639_v7 }
  0xe0   :  { %198 = vmatpush.msra.mxu3 %v146_v8  ;;  %v640_v8 = vld [vmem:[%s1614_s6 + $0x8] sm:$0xff]  ;;  %s1107_s6 = smov 256  }
  0xe1   :  { %926 = vmatmul.msk.f32.vlgmr.msra.gmra.mxu3 %vm159_vm0, %v157_v60  ;;  %833 = vmatpush.msrb.mxu1 %v640_v8 }
 0x144   :  { %v180_v10 = vpop.f32.mrf.mxu2 }
 0x145   :  { %v181_v11 = vadd.f32 %v180_v10, %v158_v9 }
 0x147   :  { %v203_v12 = vmax.f32 %v181_v11, 0.0 }
 0x149   :  { %927 = vmatpush.msk.msrb.mxu2 %vm238_vm1, %v203_v12 }
 0x14a   :  { %928 = vmatmul.msk.f32.vlgmr.msrb.gmra.mxu2 %vm213_vm2, %v205_v13 }
 0x14b   :  { %683 = vmatpush.msra.mxu2 %v637_v24 }
 0x14d   :  { %684 = vmatpush.msra.mxu2 %v635_v26 }
 0x14f   :  { %685 = vmatpush.msra.mxu2 %v633_v28 }
 0x151   :  { %686 = vmatpush.msra.mxu2 %v631_v30 }
 0x152   :  { %929 = vmatmul.msk.f32.gmra.mxu2 %vm213_vm2, %v206_v14 }
 0x153   :  { %993 = vmatpush.msrb.mxu2 %v645_v36 }
 0x155   :  { %994 = vmatpush.msrb.mxu2 %v643_v44 }
 0x157   :  { %995 = vmatpush.msrb.mxu2 %v641_v1 }
 0x159   :  { %996 = vmatpush.msrb.mxu2 %v639_v7 }
 0x15a   :  { %930 = vmatmul.msk.f32.gmra.mxu2 %vm213_vm2, %v207_v15 }
 0x162   :  { %931 = vmatmul.msk.f32.gmra.mxu2 %vm213_vm2, %v208_v16 }
 0x164   :  { %v200_v17 = vpop.f32.mrf.mxu3 }
 0x165   :  { %v201_v18 = vadd.f32 %v200_v17, %v158_v9 }
 0x167   :  { %v204_v19 = vmax.f32 %v201_v18, 0.0 }
 0x169   :  { %936 = vmatpush.msk.msrb.mxu3 %vm238_vm1, %v204_v19 }
 0x16a   :  { %932 = vmatmul.msk.f32.gmra.mxu2 %vm213_vm2, %v209_v20  ;;  %937 = vmatmul.msk.f32.vlgmr.msrb.gmra.mxu3 %vm213_vm2, %v205_v13 }
 0x16b   :  { %724 = vmatpush.msra.mxu3 %v638_v25 }
 0x16d   :  { %725 = vmatpush.msra.mxu3 %v636_v27 }
 0x16f   :  { %726 = vmatpush.msra.mxu3 %v634_v29 }
 0x171   :  { %727 = vmatpush.msra.mxu3 %v632_v31 }
 0x172   :  { %933 = vmatmul.msk.f32.gmra.mxu2 %vm213_vm2, %v210_v21  ;;  %938 = vmatmul.msk.f32.gmra.mxu3 %vm213_vm2, %v206_v14 }
 0x173   :  { %997 = vmatpush.msrb.mxu3 %v646_v37 }
 0x175   :  { %998 = vmatpush.msrb.mxu3 %v644_v45 }
 0x177   :  { %999 = vmatpush.msrb.mxu3 %v642_v2 }
 0x179   :  { %1000 = vmatpush.msrb.mxu3 %v640_v8 }
 0x17a   :  { %934 = vmatmul.msk.f32.gmra.mxu2 %vm213_vm2, %v211_v22  ;;  %939 = vmatmul.msk.f32.gmra.mxu3 %vm213_vm2, %v207_v15 }
 0x182   :  { %935 = vmatmul.msk.f32.gmra.mxu2 %vm213_vm2, %v212_v23  ;;  %940 = vmatmul.msk.f32.gmra.mxu3 %vm213_vm2, %v208_v16 }
 0x18a   :  { %941 = vmatmul.msk.f32.gmra.mxu3 %vm213_vm2, %v209_v20 }
 0x192   :  { %942 = vmatmul.msk.f32.gmra.mxu3 %vm213_vm2, %v210_v21 }
 0x19a   :  { %943 = vmatmul.msk.f32.gmra.mxu3 %vm213_vm2, %v211_v22 }
 0x1a2   :  { %944 = vmatmul.msk.f32.gmra.mxu3 %vm213_vm2, %v212_v23 }
 0x1cd   :  { %v259_v38 = vpop.f32.mrf.mxu2 }
 0x1ce   :  { %v945_v39 = vmul.f32 -1.442695, %v259_v38 }
 0x1d0   :  { %1004 = vpow2.f32 %v945_v39 }
 0x1d5   :  { %v262_v40 = vpop.f32.mrf.mxu2 }
 0x1d6   :  { %v1005_v41 = vpop.eup %1004  ;;  %v946_v42 = vmul.f32 -1.442695, %v262_v40 }
 0x1d7   :  { %v375_v43 = vadd.f32 1.0, %v1005_v41 }
 0x1d8   :  { %1006 = vpow2.f32 %v946_v42 }
 0x1d9   :  { %1008 = vrcp.f32 %v375_v43  ;;  %v402_v52 = vand.u32 2147483648, %v375_v43  ;;  %vm396_vm3 = vweird.f32 %v375_v43  ;;  %v400_v54 = vand.u32 2147483647, %v375_v43 }
 0x1db   :  { %v403_v57 = vor.u32 1.1754944e-38, %v402_v52  ;;  %vm401_vm6 = vcmp.eq.f32.partialorder %v400_v54, 8.507059e+37 }
 0x1dd   :  { %v265_v46 = vpop.f32.mrf.mxu2 }
 0x1de   :  { %v1007_v47 = vpop.eup %1006  ;;  %v947_v48 = vmul.f32 -1.442695, %v265_v46 }
 0x1df   :  { %v1009_v49 = vpop.eup %1008  ;;  %v376_v50 = vadd.f32 1.0, %v1007_v47 }
 0x1e0   :  { %v392_v51 = vmul.f32 %v1009_v49, %v375_v43  ;;  %1010 = vpow2.f32 %v947_v48  ;;  %vm397_vm4 = vweird.f32 %v1009_v49 }
 0x1e1   :  { %1012 = vrcp.f32 %v376_v50  ;;  %vm398_vm5 = vmor %vm396_vm3, %vm397_vm4  ;;  %v417_v4 = vand.u32 2147483648, %v376_v50  ;;  %vm411_vm7 = vweird.f32 %v376_v50  ;;  %v415_v6 = vand.u32 2147483647, %v376_v50 }
 0x1e2   :  { %v393_v53 = vsub.f32 1.0, %v392_v51 }
 0x1e3   :  { %v418_v13 = vor.u32 1.1754944e-38, %v417_v4  ;;  %vm416_vm10 = vcmp.eq.f32.partialorder %v415_v6, 8.507059e+37 }
 0x1e4   :  { %v394_v55 = vmul.f32 %v1009_v49, %v393_v53 }
 0x1e5   :  { %v268_v56 = vpop.f32.mrf.mxu2 }
 0x1e6   :  { %v1011_v58 = vpop.eup %1010  ;;  %v948_v59 = vmul.f32 -1.442695, %v268_v56  ;;  %v395_v60 = vadd.f32 %v1009_v49, %v394_v55 }
 0x1e7   :  { %v1013_v61 = vpop.eup %1012  ;;  %v377_v62 = vadd.f32 1.0, %v1011_v58 }
 0x1e8   :  { %1014 = vpow2.f32 %v948_v59  ;;  %v399_v63 = vsel %vm398_vm5, %v1009_v49, %v395_v60  ;;  %v407_v0 = vmul.f32 %v1013_v61, %v376_v50  ;;  %vm412_vm8 = vweird.f32 %v1013_v61 }
 0x1e9   :  { %1016 = vrcp.f32 %v377_v62  ;;  %v404_v3 = vsel %vm401_vm6, %v403_v57, %v399_v63  ;;  %vm1405_vm9 = vmor %vm411_vm7, %vm412_vm8  ;;  %vm426_vm11 = vweird.f32 %v377_v62  ;;  %v432_v23 = vand.u32 2147483648, %v377_v62 }
 0x1ea   :  { %961 = vmatmul.msk.f32.vlgmr.msra.gmra.mxu2 %vm159_vm0, %v404_v3  ;;  %969 = vmatmul.msk.f32.vlgmr.msra.gmra.mxu3 %vm159_vm0, %v404_v3  ;;  %v408_v5 = vsub.f32 1.0, %v407_v0  ;;  %v430_v25 = vand.u32 2147483647, %v377_v62 }
 0x1eb   :  { %v433_v30 = vor.u32 1.1754944e-38, %v432_v23 }
 0x1ec   :  { %v409_v9 = vmul.f32 %v1013_v61, %v408_v5  ;;  %vm431_vm14 = vcmp.eq.f32.partialorder %v430_v25, 8.507059e+37 }
 0x1ed   :  { %v271_v10 = vpop.f32.mrf.mxu2  ;;  %v303_v11 = vpop.f32.mrf.mxu3 }
 0x1ee   :  { %v1015_v14 = vpop.eup %1014  ;;  %v949_v15 = vmul.f32 -1.442695, %v271_v10  ;;  %v953_v16 = vmul.f32 -1.442695, %v303_v11  ;;  %v410_v17 = vadd.f32 %v1013_v61, %v409_v9 }
 0x1ef   :  { %v1017_v18 = vpop.eup %1016  ;;  %v378_v19 = vadd.f32 1.0, %v1015_v14 }
 0x1f0   :  { %1018 = vpow2.f32 %v949_v15  ;;  %v414_v20 = vsel %vm1405_vm9, %v1013_v61, %v410_v17  ;;  %v422_v21 = vmul.f32 %v1017_v18, %v377_v62  ;;  %vm427_vm12 = vweird.f32 %v1017_v18 }
 0x1f1   :  { %1020 = vrcp.f32 %v378_v19  ;;  %v419_v22 = vsel %vm416_vm10, %v418_v13, %v414_v20  ;;  %vm1413_vm13 = vmor %vm426_vm11, %vm427_vm12  ;;  %vm441_vm15 = vweird.f32 %v378_v19  ;;  %v447_v46 = vand.u32 2147483648, %v378_v19 }
 0x1f2   :  { %1022 = vpow2.f32 %v953_v16  ;;  %962 = vmatmul.msk.f32.gmra.mxu2 %vm159_vm0, %v419_v22  ;;  %970 = vmatmul.msk.f32.gmra.mxu3 %vm159_vm0, %v419_v22  ;;  %v423_v24 = vsub.f32 1.0, %v422_v21  ;;  %v445_v48 = vand.u32 2147483647, %v378_v19 }
 0x1f3   :  { %v448_v53 = vor.u32 1.1754944e-38, %v447_v46 }
 0x1f4   :  { %v424_v26 = vmul.f32 %v1017_v18, %v423_v24  ;;  %vm446_vm3 = vcmp.eq.f32.partialorder %v445_v48, 8.507059e+37 }
 0x1f5   :  { %v274_v27 = vpop.f32.mrf.mxu2  ;;  %v306_v28 = vpop.f32.mrf.mxu3 }
 0x1f6   :  { %v1019_v31 = vpop.eup %1018  ;;  %v950_v36 = vmul.f32 -1.442695, %v274_v27  ;;  %v954_v37 = vmul.f32 -1.442695, %v306_v28  ;;  %v425_v38 = vadd.f32 %v1017_v18, %v424_v26 }
 0x1f7   :  { %v1021_v39 = vpop.eup %1020  ;;  %v379_v40 = vadd.f32 1.0, %v1019_v31 }
 0x1f8   :  { %v1023_v41 = vpop.eup %1022  ;;  %1024 = vpow2.f32 %v950_v36  ;;  %v429_v42 = vsel %vm1413_vm13, %v1017_v18, %v425_v38  ;;  %v437_v43 = vmul.f32 %v1021_v39, %v378_v19  ;;  %vm442_vm1 = vweird.f32 %v1021_v39 }
 0x1f9   :  { %1026 = vrcp.f32 %v379_v40  ;;  %v1419_v44 = vadd.f32 1.0, %v1023_v41  ;;  %v434_v45 = vsel %vm431_vm14, %v433_v30, %v429_v42  ;;  %vm1425_vm2 = vmor %vm441_vm15, %vm442_vm1  ;;  %vm456_vm4 = vweird.f32 %v379_v40 }
 0x1fa   :  { %1028 = vpow2.f32 %v954_v37  ;;  %963 = vmatmul.msk.f32.gmra.mxu2 %vm159_vm0, %v434_v45  ;;  %971 = vmatmul.msk.f32.gmra.mxu3 %vm159_vm0, %v434_v45  ;;  %v438_v47 = vsub.f32 1.0, %v437_v43  ;;  %v460_v60 = vand.u32 2147483647, %v379_v40  ;;  %v462_v61 = vand.u32 2147483648, %v379_v40 }
 0x1fb   :  { %1030 = vrcp.f32 %v1419_v44  ;;  %v520_v0 = vand.u32 2147483647, %v1419_v44  ;;  %v522_v5 = vand.u32 2147483648, %v1419_v44  ;;  %vm516_vm6 = vweird.f32 %v1419_v44 }
 0x1fc   :  { %v439_v49 = vmul.f32 %v1021_v39, %v438_v47  ;;  %vm1443_vm7 = vcmp.eq.f32.partialorder %v460_v60, 8.507059e+37  ;;  %v463_v16 = vor.u32 1.1754944e-38, %v462_v61 }
 0x1fd   :  { %v277_v50 = vpop.f32.mrf.mxu2  ;;  %v309_v51 = vpop.f32.mrf.mxu3  ;;  %vm1447_vm9 = vcmp.eq.f32.partialorder %v520_v0, 8.507059e+37  ;;  %v523_v14 = vor.u32 1.1754944e-38, %v522_v5 }
 0x1fe   :  { %v1025_v54 = vpop.eup %1024  ;;  %v951_v55 = vmul.f32 -1.442695, %v277_v50  ;;  %v955_v56 = vmul.f32 -1.442695, %v309_v51  ;;  %v440_v57 = vadd.f32 %v1021_v39, %v439_v49 }
 0x1ff   :  { %v1027_v58 = vpop.eup %1026  ;;  %v1429_v59 = vadd.f32 1.0, %v1025_v54 }
 0x200   :  { %v1029_v62 = vpop.eup %1028  ;;  %1032 = vpow2.f32 %v951_v55  ;;  %v444_v63 = vsel %vm1425_vm2, %v1021_v39, %v440_v57  ;;  %v452_v1 = vmul.f32 %v1027_v58, %v379_v40  ;;  %vm457_vm5 = vweird.f32 %v1027_v58 }
 0x201   :  { %v1031_v2 = vpop.eup %1030  ;;  %1034 = vrcp.f32 %v1429_v59  ;;  %v1435_v3 = vadd.f32 1.0, %v1029_v62  ;;  %v449_v4 = vsel %vm446_vm3, %v448_v53, %v444_v63  ;;  %vm1452_vm10 = vmor %vm456_vm4, %vm457_vm5  ;;  %vm471_vm11 = vweird.f32 %v1429_v59 }
 0x202   :  { %1036 = vpow2.f32 %v955_v56  ;;  %964 = vmatmul.msk.f32.gmra.mxu2 %vm159_vm0, %v449_v4  ;;  %972 = vmatmul.msk.f32.gmra.mxu3 %vm159_vm0, %v449_v4  ;;  %v512_v6 = vmul.f32 %v1031_v2, %v1419_v44  ;;  %v453_v7 = vsub.f32 1.0, %v452_v1  ;;  %vm517_vm8 = vweird.f32 %v1031_v2 }
 0x203   :  { %1038 = vrcp.f32 %v1435_v3  ;;  %v535_v24 = vand.u32 2147483647, %v1435_v3  ;;  %v537_v25 = vand.u32 2147483648, %v1435_v3  ;;  %vm518_vm12 = vmor %vm516_vm6, %vm517_vm8  ;;  %v475_v37 = vand.u32 2147483647, %v1429_v59 }
 0x204   :  { %v513_v8 = vsub.f32 1.0, %v512_v6  ;;  %v454_v9 = vmul.f32 %v1027_v58, %v453_v7  ;;  %v477_v40 = vand.u32 2147483648, %v1429_v59  ;;  %vm531_vm14 = vweird.f32 %v1435_v3 }
 0x205   :  { %v280_v11 = vpop.f32.mrf.mxu2  ;;  %v312_v12 = vpop.f32.mrf.mxu3  ;;  %vm1483_vm15 = vcmp.eq.f32.partialorder %v535_v24, 8.507059e+37  ;;  %v538_v54 = vor.u32 1.1754944e-38, %v537_v25  ;;  %vm476_vm3 = vcmp.eq.f32.partialorder %v475_v37, 8.507059e+37 }
 0x206   :  { %v1033_v17 = vpop.eup %1032  ;;  %v952_v18 = vmul.f32 -1.442695, %v280_v11  ;;  %v956_v19 = vmul.f32 -1.442695, %v312_v12  ;;  %v514_v20 = vmul.f32 %v1031_v2, %v513_v8  ;;  %v455_v21 = vadd.f32 %v1027_v58, %v454_v9 }
 0x207   :  { %v1035_v22 = vpop.eup %1034  ;;  %v1456_v23 = vadd.f32 1.0, %v1033_v17  ;;  %v478_v51 = vor.u32 1.1754944e-38, %v477_v40 }
 0x208   :  { %v1037_v26 = vpop.eup %1036  ;;  %1040 = vpow2.f32 %v952_v18  ;;  %v515_v27 = vadd.f32 %v1031_v2, %v514_v20  ;;  %v459_v28 = vsel %vm1452_vm10, %v1027_v58, %v455_v21  ;;  %v467_v29 = vmul.f32 %v1035_v22, %v1429_v59 }
 0x209   :  { %v1039_v30 = vpop.eup %1038  ;;  %1042 = vrcp.f32 %v1456_v23  ;;  %v1465_v31 = vadd.f32 1.0, %v1037_v26  ;;  %v464_v36 = vsel %vm1443_vm7, %v463_v16, %v459_v28  ;;  %vm472_vm13 = vweird.f32 %v1035_v22 }
 0x20a   :  { %1044 = vpow2.f32 %v956_v19  ;;  %v519_v38 = vsel %vm518_vm12, %v1031_v2, %v515_v27  ;;  %977 = vmatmul.msk.f32.vlgmr.msrb.gmra.mxu0 %vm159_vm0, %v464_v36  ;;  %985 = vmatmul.msk.f32.vlgmr.msrb.gmra.mxu1 %vm159_vm0, %v464_v36  ;;  %v527_v39 = vmul.f32 %v1039_v30, %v1435_v3  ;;  %v468_v42 = vsub.f32 1.0, %v467_v29  ;;  %vm1489_vm2 = vmor %vm471_vm11, %vm472_vm13 }
 0x20b   :  { %1046 = vrcp.f32 %v1465_v31  ;;  %v524_v41 = vsel %vm1447_vm9, %v523_v14, %v519_v38  ;;  %vm532_vm1 = vweird.f32 %v1039_v30  ;;  %vm486_vm4 = vweird.f32 %v1456_v23 }
 0x20c   :  { %965 = vmatmul.msk.f32.gmra.mxu2 %vm159_vm0, %v524_v41  ;;  %973 = vmatmul.msk.f32.gmra.mxu3 %vm159_vm0, %v524_v41  ;;  %v528_v43 = vsub.f32 1.0, %v527_v39  ;;  %v469_v46 = vmul.f32 %v1035_v22, %v468_v42  ;;  %vm533_vm5 = vmor %vm531_vm14, %vm532_vm1  ;;  %v490_v62 = vand.u32 2147483647, %v1456_v23  ;;  %v492_v2 = vand.u32 2147483648, %v1456_v23 }
 0x20d   :  { %v315_v44 = vpop.f32.mrf.mxu3  ;;  %v550_v6 = vand.u32 2147483647, %v1465_v31  ;;  %v552_v8 = vand.u32 2147483648, %v1465_v31  ;;  %vm546_vm9 = vweird.f32 %v1465_v31 }
 0x20e   :  { %v1041_v47 = vpop.eup %1040  ;;  %v957_v48 = vmul.f32 -1.442695, %v315_v44  ;;  %v529_v49 = vmul.f32 %v1039_v30, %v528_v43  ;;  %v470_v55 = vadd.f32 %v1035_v22, %v469_v46  ;;  %v493_v14 = vor.u32 1.1754944e-38, %v492_v2 }
 0x20f   :  { %v1043_v52 = vpop.eup %1042  ;;  %v1493_v53 = vadd.f32 1.0, %v1041_v47  ;;  %vm491_vm10 = vcmp.eq.f32.partialorder %v490_v62, 8.507059e+37  ;;  %vm551_vm11 = vcmp.eq.f32.partialorder %v550_v6, 8.507059e+37  ;;  %v553_v21 = vor.u32 1.1754944e-38, %v552_v8 }
 0x210   :  { %v1045_v56 = vpop.eup %1044  ;;  %1048 = vpow2.f32 %v957_v48  ;;  %v530_v57 = vadd.f32 %v1039_v30, %v529_v49  ;;  %v482_v58 = vmul.f32 %v1043_v52, %v1456_v23  ;;  %v474_v61 = vsel %vm1489_vm2, %v1035_v22, %v470_v55 }
 0x211   :  { %v1047_v60 = vpop.eup %1046  ;;  %1050 = vrcp.f32 %v1493_v53  ;;  %v1498_v59 = vadd.f32 1.0, %v1045_v56  ;;  %v479_v0 = vsel %vm476_vm3, %v478_v51, %v474_v61  ;;  %vm487_vm6 = vweird.f32 %v1043_v52 }
 0x212   :  { %v534_v63 = vsel %vm533_vm5, %v1039_v30, %v530_v57  ;;  %v542_v1 = vmul.f32 %v1047_v60, %v1465_v31  ;;  %978 = vmatmul.msk.f32.gmra.mxu0 %vm159_vm0, %v479_v0  ;;  %986 = vmatmul.msk.f32.gmra.mxu1 %vm159_vm0, %v479_v0  ;;  %v483_v3 = vsub.f32 1.0, %v482_v58  ;;  %vm547_vm7 = vweird.f32 %v1047_v60  ;;  %vm1519_vm8 = vmor %vm486_vm4, %vm487_vm6 }
 0x213   :  { %1052 = vrcp.f32 %v1498_v59  ;;  %v539_v4 = vsel %vm1483_vm15, %v538_v54, %v534_v63  ;;  %vm548_vm12 = vmor %vm546_vm9, %vm547_vm7  ;;  %vm501_vm13 = vweird.f32 %v1493_v53  ;;  %v507_v26 = vand.u32 2147483648, %v1493_v53 }
 0x214   :  { %966 = vmatmul.msk.f32.gmra.mxu2 %vm159_vm0, %v539_v4  ;;  %974 = vmatmul.msk.f32.gmra.mxu3 %vm159_vm0, %v539_v4  ;;  %v543_v5 = vsub.f32 1.0, %v542_v1  ;;  %v484_v9 = vmul.f32 %v1043_v52, %v483_v3  ;;  %v505_v29 = vand.u32 2147483647, %v1493_v53  ;;  %v565_v36 = vand.u32 2147483647, %v1498_v59 }
 0x215   :  { %v318_v7 = vpop.f32.mrf.mxu3  ;;  %v567_v37 = vand.u32 2147483648, %v1498_v59  ;;  %v508_v43 = vor.u32 1.1754944e-38, %v507_v26  ;;  %vm561_vm3 = vweird.f32 %v1498_v59 }
 0x216   :  { %v1049_v10 = vpop.eup %1048  ;;  %v958_v11 = vmul.f32 -1.442695, %v318_v7  ;;  %v544_v12 = vmul.f32 %v1047_v60, %v543_v5  ;;  %v485_v17 = vadd.f32 %v1043_v52, %v484_v9  ;;  %vm506_vm2 = vcmp.eq.f32.partialorder %v505_v29, 8.507059e+37 }
 0x217   :  { %v1051_v15 = vpop.eup %1050  ;;  %v1523_v16 = vadd.f32 1.0, %v1049_v10  ;;  %v568_v49 = vor.u32 1.1754944e-38, %v567_v37  ;;  %vm566_vm5 = vcmp.eq.f32.partialorder %v565_v36, 8.507059e+37 }
 0x218   :  { %1054 = vpow2.f32 %v958_v11  ;;  %v545_v18 = vadd.f32 %v1047_v60, %v544_v12  ;;  %v497_v19 = vmul.f32 %v1051_v15, %v1493_v53  ;;  %v489_v22 = vsel %vm1519_vm8, %v1043_v52, %v485_v17 }
 0x219   :  { %v1053_v20 = vpop.eup %1052  ;;  %1056 = vrcp.f32 %v1523_v16  ;;  %v494_v24 = vsel %vm491_vm10, %v493_v14, %v489_v22  ;;  %vm502_vm14 = vweird.f32 %v1051_v15  ;;  %v582_v55 = vand.u32 2147483648, %v1523_v16 }
 0x21a   :  { %v549_v23 = vsel %vm548_vm12, %v1047_v60, %v545_v18  ;;  %v557_v25 = vmul.f32 %v1053_v20, %v1498_v59  ;;  %979 = vmatmul.msk.f32.gmra.mxu0 %vm159_vm0, %v494_v24  ;;  %987 = vmatmul.msk.f32.gmra.mxu1 %vm159_vm0, %v494_v24  ;;  %v498_v28 = vsub.f32 1.0, %v497_v19  ;;  %vm562_vm15 = vweird.f32 %v1053_v20  ;;  %vm1542_vm1 = vmor %vm501_vm13, %vm502_vm14 }
 0x21b   :  { %v554_v27 = vsel %vm551_vm11, %v553_v21, %v549_v23  ;;  %vm563_vm4 = vmor %vm561_vm3, %vm562_vm15  ;;  %v580_v57 = vand.u32 2147483647, %v1523_v16  ;;  %vm576_vm7 = vweird.f32 %v1523_v16  ;;  %v583_v0 = vor.u32 1.1754944e-38, %v582_v55 }
 0x21c   :  { %967 = vmatmul.msk.f32.gmra.mxu2 %vm159_vm0, %v554_v27  ;;  %975 = vmatmul.msk.f32.gmra.mxu3 %vm159_vm0, %v554_v27  ;;  %v558_v30 = vsub.f32 1.0, %v557_v25  ;;  %v499_v38 = vmul.f32 %v1051_v15, %v498_v28 }
 0x21d   :  { %v321_v31 = vpop.f32.mrf.mxu3  ;;  %vm581_vm9 = vcmp.eq.f32.partialorder %v580_v57, 8.507059e+37 }
 0x21e   :  { %v1055_v39 = vpop.eup %1054  ;;  %v959_v40 = vmul.f32 -1.442695, %v321_v31  ;;  %v559_v41 = vmul.f32 %v1053_v20, %v558_v30  ;;  %v500_v46 = vadd.f32 %v1051_v15, %v499_v38 }
 0x21f   :  { %v1057_v44 = vpop.eup %1056  ;;  %v388_v45 = vadd.f32 1.0, %v1055_v39 }
 0x220   :  { %1058 = vpow2.f32 %v959_v40  ;;  %v560_v47 = vadd.f32 %v1053_v20, %v559_v41  ;;  %v572_v48 = vmul.f32 %v1057_v44, %v1523_v16  ;;  %v504_v50 = vsel %vm1542_vm1, %v1051_v15, %v500_v46 }
 0x221   :  { %1060 = vrcp.f32 %v388_v45  ;;  %v509_v52 = vsel %vm506_vm2, %v508_v43, %v504_v50  ;;  %vm577_vm6 = vweird.f32 %v1057_v44  ;;  %v597_v5 = vand.u32 2147483648, %v388_v45 }
 0x222   :  { %v564_v51 = vsel %vm563_vm4, %v1053_v20, %v560_v47  ;;  %v573_v53 = vsub.f32 1.0, %v572_v48  ;;  %980 = vmatmul.msk.f32.gmra.mxu0 %vm159_vm0, %v509_v52  ;;  %988 = vmatmul.msk.f32.gmra.mxu1 %vm159_vm0, %v509_v52  ;;  %vm578_vm8 = vmor %vm576_vm7, %vm577_vm6  ;;  %v595_v7 = vand.u32 2147483647, %v388_v45  ;;  %vm591_vm11 = vweird.f32 %v388_v45 }
 0x223   :  { %v569_v54 = vsel %vm566_vm5, %v568_v49, %v564_v51  ;;  %v598_v12 = vor.u32 1.1754944e-38, %v597_v5 }
 0x224   :  { %968 = vmatmul.msk.f32.gmra.mxu2 %vm159_vm0, %v569_v54  ;;  %976 = vmatmul.msk.f32.gmra.mxu3 %vm159_vm0, %v569_v54  ;;  %v574_v56 = vmul.f32 %v1057_v44, %v573_v53  ;;  %vm596_vm13 = vcmp.eq.f32.partialorder %v595_v7, 8.507059e+37 }
 0x225   :  { %v324_v58 = vpop.f32.mrf.mxu3 }
 0x226   :  { %v1059_v60 = vpop.eup %1058  ;;  %v960_v59 = vmul.f32 -1.442695, %v324_v58  ;;  %v575_v61 = vadd.f32 %v1057_v44, %v574_v56 }
 0x227   :  { %v1061_v62 = vpop.eup %1060  ;;  %v389_v63 = vadd.f32 1.0, %v1059_v60 }
 0x228   :  { %1062 = vpow2.f32 %v960_v59  ;;  %v579_v1 = vsel %vm578_vm8, %v1057_v44, %v575_v61  ;;  %v587_v2 = vmul.f32 %v1061_v62, %v388_v45  ;;  %vm592_vm10 = vweird.f32 %v1061_v62  ;;  %v1068_v59 = vld [vmem:[%s1608_s0 + $0x20] sm:$0xff] }
 0x229   :  { %1064 = vrcp.f32 %v389_v63  ;;  %v584_v4 = vsel %vm581_vm9, %v583_v0, %v579_v1  ;;  %vm593_vm12 = vmor %vm591_vm11, %vm592_vm10  ;;  %v612_v17 = vand.u32 2147483648, %v389_v63  ;;  %v610_v19 = vand.u32 2147483647, %v389_v63 }
 0x22a   :  { %v588_v3 = vsub.f32 1.0, %v587_v2  ;;  %981 = vmatmul.msk.f32.gmra.mxu0 %vm159_vm0, %v584_v4  ;;  %989 = vmatmul.msk.f32.gmra.mxu1 %vm159_vm0, %v584_v4  ;;  %vm606_vm15 = vweird.f32 %v389_v63 }
 0x22b   :  { %v613_v22 = vor.u32 1.1754944e-38, %v612_v17  ;;  %vm611_vm2 = vcmp.eq.f32.partialorder %v610_v19, 8.507059e+37 }
 0x22c   :  { %v589_v6 = vmul.f32 %v1061_v62, %v588_v3  ;;  %v1070_v3 = vld [vmem:[%s1608_s0 + $0x30] sm:$0xff] }
 0x22e   :  { %v1063_v8 = vpop.eup %1062  ;;  %v590_v9 = vadd.f32 %v1061_v62, %v589_v6  ;;  %v1071_v6 = vld [vmem:[%s1608_s0 + $0x38] sm:$0xff] }
 0x22f   :  { %v1065_v10 = vpop.eup %1064  ;;  %v390_v11 = vadd.f32 1.0, %v1063_v8 }
 0x230   :  { %v594_v13 = vsel %vm593_vm12, %v1061_v62, %v590_v9  ;;  %v602_v14 = vmul.f32 %v1065_v10, %v389_v63  ;;  %vm607_vm14 = vweird.f32 %v1065_v10  ;;  %v1069_v62 = vld [vmem:[%s1608_s0 + $0x28] sm:$0xff] }
 0x231   :  { %1066 = vrcp.f32 %v390_v11  ;;  %v599_v15 = vsel %vm596_vm13, %v598_v12, %v594_v13  ;;  %vm608_vm1 = vmor %vm606_vm15, %vm607_vm14  ;;  %v627_v27 = vand.u32 2147483648, %v390_v11  ;;  %v625_v29 = vand.u32 2147483647, %v390_v11 }
 0x232   :  { %v603_v16 = vsub.f32 1.0, %v602_v14  ;;  %982 = vmatmul.msk.f32.gmra.mxu0 %vm159_vm0, %v599_v15  ;;  %990 = vmatmul.msk.f32.gmra.mxu1 %vm159_vm0, %v599_v15  ;;  %vm621_vm4 = vweird.f32 %v390_v11  ;;  %v1072_v14 = vld [vmem:[%s1608_s0 + $0x40] sm:$0xff] }
 0x233   :  { %v628_v31 = vor.u32 1.1754944e-38, %v627_v27  ;;  %vm626_vm6 = vcmp.eq.f32.partialorder %v625_v29, 8.507059e+37 }
 0x234   :  { %v604_v18 = vmul.f32 %v1065_v10, %v603_v16  ;;  %v1073_v16 = vld [vmem:[%s1608_s0 + $0x48] sm:$0xff] }
 0x236   :  { %v605_v20 = vadd.f32 %v1065_v10, %v604_v18 }
 0x237   :  { %v1067_v21 = vpop.eup %1066 }
 0x238   :  { %v617_v23 = vmul.f32 %v1067_v21, %v390_v11  ;;  %v609_v24 = vsel %vm608_vm1, %v1065_v10, %v605_v20  ;;  %vm622_vm3 = vweird.f32 %v1067_v21 }
 0x239   :  { %v614_v25 = vsel %vm611_vm2, %v613_v22, %v609_v24  ;;  %vm623_vm5 = vmor %vm621_vm4, %vm622_vm3  ;;  %v1074_v24 = vld [vmem:[%s1608_s0 + $0x50] sm:$0xff] }
 0x23a   :  { %v618_v26 = vsub.f32 1.0, %v617_v23  ;;  %983 = vmatmul.msk.f32.gmra.mxu0 %vm159_vm0, %v614_v25  ;;  %991 = vmatmul.msk.f32.gmra.mxu1 %vm159_vm0, %v614_v25 }
 0x23c   :  { %v619_v28 = vmul.f32 %v1067_v21, %v618_v26  ;;  %v1075_v26 = vld [vmem:[%s1608_s0 + $0x58] sm:$0xff] }
 0x23e   :  { %v620_v30 = vadd.f32 %v1067_v21, %v619_v28 }
 0x240   :  { %v624_v36 = vsel %vm623_vm5, %v1067_v21, %v620_v30 }
 0x241   :  { %v629_v37 = vsel %vm626_vm6, %v628_v31, %v624_v36  ;;  %v1076_v36 = vld [vmem:[%s1608_s0 + $0x60] sm:$0xff] }
 0x242   :  { %984 = vmatmul.msk.f32.vlgmr.msrb.gmra.mxu2 %vm159_vm0, %v629_v37  ;;  %992 = vmatmul.msk.f32.vlgmr.msrb.gmra.mxu3 %vm159_vm0, %v629_v37 }
 0x26d   :  { %v688_v38 = vpop.f32.mrf.mxu2  ;;  %v729_v39 = vpop.f32.mrf.mxu3 }
 0x275   :  { %v691_v40 = vpop.f32.mrf.mxu2  ;;  %v732_v41 = vpop.f32.mrf.mxu3 }
 0x27d   :  { %v694_v48 = vpop.f32.mrf.mxu2  ;;  %v735_v49 = vpop.f32.mrf.mxu3 }
 0x285   :  { %v697_v56 = vpop.f32.mrf.mxu2  ;;  %v738_v57 = vpop.f32.mrf.mxu3 }
 0x287   :  { %v794_v42 = vpop.f32.mrf.mxu0  ;;  %v835_v43 = vpop.f32.mrf.mxu1 }
 0x288   :  { %v859_v44 = vmul.f32 %v794_v42, %v688_v38  ;;  %v860_v45 = vmul.f32 %v835_v43, %v729_v39  ;;  %v1077_v38 = vld [vmem:[%s1608_s0 + $0x68] sm:$0xff] }
 0x28a   :  { %v875_v46 = vmul.f32 %v859_v44, %v1248_v32  ;;  %v876_v47 = vmul.f32 %v860_v45, %v1253_v33 }
 0x28c   :  { %891 = vst [vmem:[#allocation2] sm:$0xff] %v875_v46  ;;  %v1078_v46 = vld [vmem:[%s1608_s0 + $0x70] sm:$0xff] }
 0x28d   :  { %892 = vst [vmem:[#allocation2 + $0x8] sm:$0xff] %v876_v47 }
 0x28f   :  { %v797_v50 = vpop.f32.mrf.mxu0  ;;  %v838_v51 = vpop.f32.mrf.mxu1 }
 0x290   :  { %v861_v52 = vmul.f32 %v797_v50, %v691_v40  ;;  %v862_v53 = vmul.f32 %v838_v51, %v732_v41  ;;  %v741_v63 = vpop.f32.mrf.mxu3 }
 0x292   :  { %v877_v54 = vmul.f32 %v861_v52, %v1260_v34  ;;  %v878_v55 = vmul.f32 %v862_v53, %v1265_v35  ;;  %v700_v35 = vpop.f32.mrf.mxu2 }
 0x294   :  { %893 = vst [vmem:[#allocation2 + $0x10] sm:$0xff] %v877_v54 }
 0x295   :  { %894 = vst [vmem:[#allocation2 + $0x18] sm:$0xff] %v878_v55 }
 0x297   :  { %v800_v58 = vpop.f32.mrf.mxu0  ;;  %v841_v32 = vpop.f32.mrf.mxu1 }
 0x298   :  { %v863_v60 = vmul.f32 %v800_v58, %v694_v48  ;;  %v864_v33 = vmul.f32 %v841_v32, %v735_v49  ;;  %v744_v11 = vpop.f32.mrf.mxu3  ;;  %v1079_v48 = vld [vmem:[%s1608_s0 + $0x78] sm:$0xff] }
 0x29a   :  { %v879_v61 = vmul.f32 %v1068_v59, %v863_v60  ;;  %v880_v34 = vmul.f32 %v1069_v62, %v864_v33  ;;  %v703_v10 = vpop.f32.mrf.mxu2 }
 0x29c   :  { %895 = vst [vmem:[#allocation2 + $0x20] sm:$0xff] %v879_v61 }
 0x29d   :  { %896 = vst [vmem:[#allocation2 + $0x28] sm:$0xff] %v880_v34 }
 0x29f   :  { %v803_v0 = vpop.f32.mrf.mxu0  ;;  %v844_v1 = vpop.f32.mrf.mxu1 }
 0x2a0   :  { %v865_v2 = vmul.f32 %v803_v0, %v697_v56  ;;  %v866_v4 = vmul.f32 %v844_v1, %v738_v57  ;;  %v747_v23 = vpop.f32.mrf.mxu3 }
 0x2a2   :  { %v881_v5 = vmul.f32 %v1070_v3, %v865_v2  ;;  %v882_v7 = vmul.f32 %v1071_v6, %v866_v4  ;;  %v706_v22 = vpop.f32.mrf.mxu2 }
 0x2a4   :  { %897 = vst [vmem:[#allocation2 + $0x30] sm:$0xff] %v881_v5 }
 0x2a5   :  { %898 = vst [vmem:[#allocation2 + $0x38] sm:$0xff] %v882_v7 }
 0x2a7   :  { %v806_v8 = vpop.f32.mrf.mxu0  ;;  %v847_v9 = vpop.f32.mrf.mxu1 }
 0x2a8   :  { %v867_v12 = vmul.f32 %v806_v8, %v700_v35  ;;  %v868_v13 = vmul.f32 %v847_v9, %v741_v63  ;;  %v750_v41 = vpop.f32.mrf.mxu3 }
 0x2aa   :  { %v883_v15 = vmul.f32 %v1072_v14, %v867_v12  ;;  %v884_v17 = vmul.f32 %v1073_v16, %v868_v13  ;;  %v709_v40 = vpop.f32.mrf.mxu2 }
 0x2ac   :  { %899 = vst [vmem:[#allocation2 + $0x40] sm:$0xff] %v883_v15 }
 0x2ad   :  { %900 = vst [vmem:[#allocation2 + $0x48] sm:$0xff] %v884_v17 }
 0x2af   :  { %v809_v18 = vpop.f32.mrf.mxu0  ;;  %v850_v19 = vpop.f32.mrf.mxu1 }
 0x2b0   :  { %v869_v20 = vmul.f32 %v809_v18, %v703_v10  ;;  %v870_v21 = vmul.f32 %v850_v19, %v744_v11 }
 0x2b2   :  { %v885_v25 = vmul.f32 %v1074_v24, %v869_v20  ;;  %v886_v27 = vmul.f32 %v1075_v26, %v870_v21 }
 0x2b4   :  { %901 = vst [vmem:[#allocation2 + $0x50] sm:$0xff] %v885_v25 }
 0x2b5   :  { %902 = vst [vmem:[#allocation2 + $0x58] sm:$0xff] %v886_v27 }
 0x2b7   :  { %v812_v28 = vpop.f32.mrf.mxu0  ;;  %v853_v29 = vpop.f32.mrf.mxu1 }
 0x2b8   :  { %v871_v30 = vmul.f32 %v812_v28, %v706_v22  ;;  %v872_v31 = vmul.f32 %v853_v29, %v747_v23 }
 0x2ba   :  { %v887_v37 = vmul.f32 %v1076_v36, %v871_v30  ;;  %v888_v39 = vmul.f32 %v1077_v38, %v872_v31 }
 0x2bc   :  { %903 = vst [vmem:[#allocation2 + $0x60] sm:$0xff] %v887_v37 }
 0x2bd   :  { %904 = vst [vmem:[#allocation2 + $0x68] sm:$0xff] %v888_v39 }
 0x2c5   :  { %v815_v42 = vpop.f32.mrf.mxu2  ;;  %v856_v43 = vpop.f32.mrf.mxu3 }
 0x2c6   :  { %v873_v44 = vmul.f32 %v815_v42, %v709_v40  ;;  %v874_v45 = vmul.f32 %v856_v43, %v750_v41 }
 0x2c8   :  { %v889_v47 = vmul.f32 %v1078_v46, %v873_v44  ;;  %v890_v49 = vmul.f32 %v1079_v48, %v874_v45 }
 0x2ca   :  { %905 = vst [vmem:[#allocation2 + $0x70] sm:$0xff] %v889_v47 }
 0x2cb   :  { %906 = vst [vmem:[#allocation2 + $0x78] sm:$0xff] %v890_v49 }
 0x2cc   :  { %919 = dma.vmem_to_hbm [thread:$0]  %s912_s17, 2048, %s914_s20, [#allocation3], %s1107_s6, %s1107_s6, %s1108_s4  }
 0x2cd   :  { %1104 = dma.done.wait [#allocation3], 2048  }
 0x2ce   :  { %1105 = vsyncadd [#allocation3], 4294965248 }
 0x2cf   :  { %924 = vsyncpa [#allocation3], 1 }

</bundles_post_ra>
